<compile_context>
chip_gen: v6e
topology: v6e:2x2x1
jax: 0.10.0
libtpu: 0.0.40
codegen_flags: <defaults>
</compile_context>

<pallas_src>
import functools

import jax
import jax.numpy as jnp
from jax.experimental import pallas as pl
from jax.experimental.pallas import tpu as pltpu


def _label_smoothing_kernel(x_ref, out_ref, *, smoothing, n_total, tile_n,
                            steps_per_slice, use_bf16_exp):
    p = pl.program_id(0)          # slice index ("parallel" -> per TensorCore)
    i = pl.program_id(1)          # step within this slice ("arbitrary")

    @pl.when(i == 0)
    def _():
        out_ref[...] = jnp.zeros_like(out_ref)

    x = x_ref[...].astype(jnp.float32)                         # (tile_n, C) f32 math

    m = jnp.max(x, axis=-1, keepdims=True)                     # (tile_n, 1)
    z = x - m
    if use_bf16_exp:
        # bf16 EUP exp (~2x exp throughput on v6e/v7x); f32 accumulation.
        s = jnp.sum(jnp.exp(z.astype(jnp.bfloat16)),
                    axis=-1, keepdims=True, dtype=jnp.float32)
    else:
        s = jnp.sum(jnp.exp(z), axis=-1, keepdims=True)
    lse = jnp.log(s)                                           # (tile_n, 1)
    x_mean = jnp.mean(x, axis=-1, keepdims=True)               # (tile_n, 1)

    # Per-row loss minus the target term (handled in the wrapper):
    #   (m + lse) - smoothing * mean_c(x)
    row_term = (m + lse) - smoothing * x_mean                  # (tile_n, 1)

    # Mask rows of partial / padding tiles.  Padding steps (step >= #real steps)
    # have step*tile_n >= n_total, so they are fully masked.  Garbage rows may
    # produce NaN/Inf in row_term but jnp.where is a select, so it never enters
    # the accumulated sum.
    step = p * steps_per_slice + i
    row_ids = step * tile_n + jax.lax.broadcasted_iota(jnp.int32, (tile_n, 1), 0)
    masked = jnp.where(row_ids < n_total, row_term, 0.0)       # (tile_n, 1)

    # Resident output block per slice: per-row partial sums across the steps.
    out_ref[...] += masked.reshape(out_ref.shape)


def _tpu_generation_params():
    """Heuristic chip-generation parameters (never needed for correctness)."""
    kind = ""
    try:
        kind = jax.devices()[0].device_kind.lower()
    except Exception:
        pass
    if "v7" in kind:
        # 64 MiB physical VMEM, bf16 EUP, compute-bound at 3.2 TB/s HBM.
        return {"vmem_phys": 64 << 20, "bf16_eup": True,
                "block_target": int(2.5 * (1 << 20))}
    if "v6" in kind:
        return {"vmem_phys": 128 << 20, "bf16_eup": True,
                "block_target": 8 << 20}
    if "v5" in kind and ("lite" in kind or "5e" in kind):
        # v5e: HBM-bound, no bf16 EUP/VPU; modest blocks + explicit VMEM limit.
        return {"vmem_phys": 128 << 20, "bf16_eup": False,
                "block_target": 2 << 20}
    # Unknown / older generations: conservative defaults.
    return {"vmem_phys": 64 << 20, "bf16_eup": False,
            "block_target": 2 << 20}


def label_smoothing_loss(x, target, smoothing=0.1, tile_n=None, use_bf16_exp=None):
    """x: (N, C) float (any float dtype), target: (N,) int -> scalar f32 loss."""
    n, c = x.shape
    confidence = 1.0 - smoothing
    info = _tpu_generation_params()

    itemsize = jnp.dtype(x.dtype).itemsize
    align = {1: 32, 2: 16}.get(itemsize, 8)       # dtype-aware sublane alignment

    if tile_n is None:
        tile_n = info["block_target"] // max(c * itemsize, 1)
        tile_n = max(align, min(2048, (tile_n // align) * align))
    if tile_n >= n:
        tile_n = n                                # single full-extent block is legal
    else:
        tile_n = max(align, (tile_n // align) * align)

    steps = pl.cdiv(n, tile_n)                    # number of real row blocks
    num_slices = 2 if steps >= 2 else 1           # v7x megacore split (harmless on 1-TC chips)
    steps_per_slice = pl.cdiv(steps, num_slices)

    # Explicit scoped-VMEM budget: 2x double-buffered native block + f32 intermediates.
    block_native = tile_n * c * itemsize
    block_f32 = tile_n * c * 4
    vmem_need = 2 * block_native + 4 * block_f32 + 4 * tile_n * 4 + (1 << 20)
    vmem_limit = int(min(0.75 * info["vmem_phys"],
                         max(1.5 * vmem_need, 32 << 20)))

    if use_bf16_exp is None:
        use_bf16_exp = bool(info["bf16_eup"]) and x.dtype == jnp.bfloat16

    kernel = functools.partial(
        _label_smoothing_kernel,
        smoothing=float(smoothing), n_total=n, tile_n=tile_n,
        steps_per_slice=steps_per_slice, use_bf16_exp=bool(use_bf16_exp),
    )

    cost = pl.CostEstimate(
        flops=5 * n * c,
        transcendentals=n * c + n,                # exp per element + per-row log
        bytes_accessed=n * c * itemsize + num_slices * tile_n * 4,
    )

    partials = pl.pallas_call(
        kernel,
        out_shape=jax.ShapeDtypeStruct((num_slices, tile_n, 1), jnp.float32),
        grid_spec=pltpu.PrefetchScalarGridSpec(
            num_scalar_prefetch=0,
            grid=(num_slices, steps_per_slice),
            in_specs=[
                # Clamp padding steps so the DMA stays in bounds; those steps are
                # fully masked in the kernel.
                pl.BlockSpec(
                    (tile_n, c),
                    lambda p, i: (jnp.minimum(p * steps_per_slice + i, steps - 1), 0)),
            ],
            out_specs=pl.BlockSpec((1, tile_n, 1), lambda p, i: (p, 0, 0)),
        ),
        compiler_params=pltpu.CompilerParams(
            dimension_semantics=("parallel", "arbitrary"),
            vmem_limit_bytes=vmem_limit,
        ),
        cost_estimate=cost,
    )(x)                                          # native dtype over HBM

    # Target term outside the kernel (review: no one-hot gather on VPU/XLU).
    x_t = jnp.take_along_axis(x, target.reshape(n, 1).astype(jnp.int32), axis=-1)
    x_t_mean = jnp.mean(x_t.astype(jnp.float32))

    return jnp.sum(partials, dtype=jnp.float32) / jnp.float32(n) - confidence * x_t_mean


def _reference(x, target, smoothing=0.1):
    confidence = 1.0 - smoothing
    logprobs = jax.nn.log_softmax(x.astype(jnp.float32), axis=-1)
    nll = -jnp.take_along_axis(logprobs, target[:, None].astype(jnp.int32), axis=-1)[:, 0]
    smooth = -jnp.mean(logprobs, axis=-1)
    return jnp.mean(confidence * nll + smoothing * smooth)


if __name__ == "__main__":
    key = jax.random.PRNGKey(0)
    kx, kt = jax.random.split(key)
    N, C = 20, 40
    smoothing = 0.1

    x = jax.random.normal(kx, (N, C), dtype=jnp.float32)
    target = jax.random.randint(kt, (N,), 0, C, dtype=jnp.int32)

    ref = jax.block_until_ready(_reference(x, target, smoothing=smoothing))

    # f32, explicit small tile -> exercises partial last tile, the 2-slice
    # ("megacore") grid, and the clamped+masked padding step (steps=3 -> 2x2 grid).
    loss = jax.block_until_ready(
        label_smoothing_loss(x, target, smoothing=smoothing, tile_n=8))
    assert jnp.allclose(loss, ref, atol=1e-5, rtol=1e-5), (loss, ref)

    # f32 with the default generation-aware tile heuristic (single full block here).
    loss_d = jax.block_until_ready(
        label_smoothing_loss(x, target, smoothing=smoothing))
    assert jnp.allclose(loss_d, ref, atol=1e-5, rtol=1e-5), (loss_d, ref)

    # bf16 input: native-dtype DMA, f32 in-kernel math (bf16 exp only where the
    # EUP supports it).  16-row tiles respect the bf16 sublane packing.
    xb = x.astype(jnp.bfloat16)
    loss_b = jax.block_until_ready(
        label_smoothing_loss(xb, target, smoothing=smoothing, tile_n=16))
    ref_b = jax.block_until_ready(_reference(xb, target, smoothing=smoothing))
    assert jnp.allclose(loss_b, ref_b, atol=5e-3, rtol=5e-3), (loss_b, ref_b)

    print("KERNEL_OK")
</pallas_src>

<mosaic_0001>
module attributes {stable_mosaic.version = 11 : i64} {
  func.func @_label_smoothing_kernel(%arg0: i32, %arg1: i32, %arg2: memref<8x40xf32, #tpu.memory_space<vmem>>, %arg3: memref<1x8x1xf32, #tpu.memory_space<vmem>>) attributes {dimension_semantics = [#tpu.dimension_semantics<parallel>, #tpu.dimension_semantics<arbitrary>], iteration_bounds = array<i64: 2, 2>, scalar_prefetch = 0 : i64, scratch_operands = 0 : i64, tpu.core_type = #tpu.core_type<tc>, window_params = [{transform_indices = @transform_0, window_bounds = array<i64: 8, 40>}, {transform_indices = @transform_1, window_bounds = array<i64: 1, 8, 1>}]} {
    %c0_i32 = arith.constant 0 : i32
    %0 = arith.cmpi eq, %arg1, %c0_i32 : i32
    %1 = arith.extui %0 : i1 to i32
    %c0_i32_0 = arith.constant 0 : i32
    %2 = arith.cmpi ne, %1, %c0_i32_0 : i32
    scf.if %2 {
      %cst_13 = arith.constant 0.000000e+00 : f32
      %34 = vector.broadcast %cst_13 : f32 to vector<1x8x1xf32>
      %c0_14 = arith.constant 0 : index
      %c0_15 = arith.constant 0 : index
      %c0_16 = arith.constant 0 : index
      %35 = vector.load %arg3[%c0_14, %c0_15, %c0_16] : memref<1x8x1xf32, #tpu.memory_space<vmem>>, vector<1x8x1xf32>
      tpu.vector_store %arg3[%c0_14, %c0_15, %c0_16], %34 {strides = array<i32>} : memref<1x8x1xf32, #tpu.memory_space<vmem>>, vector<1x8x1xf32>,
    } else {
    }
    %c0 = arith.constant 0 : index
    %c0_1 = arith.constant 0 : index
    %3 = vector.load %arg2[%c0, %c0_1] : memref<8x40xf32, #tpu.memory_space<vmem>>, vector<8x40xf32>
    %cst = arith.constant dense<0xFF800000> : vector<8xf32>
    %4 = vector.multi_reduction <maximumf>, %3, %cst [1] : vector<8x40xf32> to vector<8xf32>
    %5 = vector.shape_cast %4 : vector<8xf32> to vector<8x1xf32>
    %6 = vector.broadcast %5 : vector<8x1xf32> to vector<8x40xf32>
    %7 = arith.subf %3, %6 : vector<8x40xf32>
    %8 = math.exp %7 : vector<8x40xf32>
    %cst_2 = arith.constant dense<0.000000e+00> : vector<8xf32>
    %9 = vector.multi_reduction <add>, %8, %cst_2 [1] : vector<8x40xf32> to vector<8xf32>
    %10 = vector.shape_cast %9 : vector<8xf32> to vector<8x1xf32>
    %11 = math.log %10 : vector<8x1xf32>
    %cst_3 = arith.constant dense<0.000000e+00> : vector<8xf32>
    %12 = vector.multi_reduction <add>, %3, %cst_3 [1] : vector<8x40xf32> to vector<8xf32>
    %13 = vector.shape_cast %12 : vector<8xf32> to vector<8x1xf32>
    %cst_4 = arith.constant 4.000000e+01 : f32
    %14 = vector.broadcast %cst_4 : f32 to vector<8x1xf32>
    %15 = arith.divf %13, %14 : vector<8x1xf32>
    %16 = arith.addf %5, %11 : vector<8x1xf32>
    %cst_5 = arith.constant 1.000000e-01 : f32
    %17 = vector.broadcast %cst_5 : f32 to vector<8x1xf32>
    %18 = arith.mulf %17, %15 : vector<8x1xf32>
    %19 = arith.subf %16, %18 : vector<8x1xf32>
    %c2_i32 = arith.constant 2 : i32
    %20 = arith.muli %arg0, %c2_i32 : i32
    %21 = arith.addi %20, %arg1 : i32
    %c8_i32 = arith.constant 8 : i32
    %22 = arith.muli %21, %c8_i32 : i32
    %23 = tpu.iota {dimensions = array<i32: 0>} : vector<8x1xi32>
    %24 = vector.broadcast %22 : i32 to vector<8x1xi32>
    %25 = arith.addi %24, %23 : vector<8x1xi32>
    %c20_i32 = arith.constant 20 : i32
    %26 = vector.broadcast %c20_i32 : i32 to vector<8x1xi32>
    %27 = arith.cmpi slt, %25, %26 : vector<8x1xi32>
    %cst_6 = arith.constant 0.000000e+00 : f32
    %28 = vector.broadcast %cst_6 : f32 to vector<8x1xf32>
    %29 = arith.select %27, %19, %28 : vector<8x1xi1>, vector<8x1xf32>
    %c0_7 = arith.constant 0 : index
    %c0_8 = arith.constant 0 : index
    %c0_9 = arith.constant 0 : index
    %30 = vector.load %arg3[%c0_7, %c0_8, %c0_9] : memref<1x8x1xf32, #tpu.memory_space<vmem>>, vector<1x8x1xf32>
    %31 = vector.shape_cast %29 : vector<8x1xf32> to vector<1x8x1xf32>
    %32 = arith.addf %30, %31 : vector<1x8x1xf32>
    %c0_10 = arith.constant 0 : index
    %c0_11 = arith.constant 0 : index
    %c0_12 = arith.constant 0 : index
    %33 = vector.load %arg3[%c0_10, %c0_11, %c0_12] : memref<1x8x1xf32, #tpu.memory_space<vmem>>, vector<1x8x1xf32>
    tpu.vector_store %arg3[%c0_10, %c0_11, %c0_12], %32 {strides = array<i32>} : memref<1x8x1xf32, #tpu.memory_space<vmem>>, vector<1x8x1xf32>,
    return
  }
  func.func @transform_0(%arg0: i32, %arg1: i32) -> (i32, i32) {
    %c2_i32 = arith.constant 2 : i32
    %0 = arith.muli %arg0, %c2_i32 : i32
    %1 = arith.addi %0, %arg1 : i32
    %c2_i32_0 = arith.constant 2 : i32
    %2 = arith.minsi %1, %c2_i32_0 : i32
    %c0_i32 = arith.constant 0 : i32
    %c0_i32_1 = arith.constant 0 : i32
    return %2, %c0_i32 : i32, i32
  }
  func.func @transform_1(%arg0: i32, %arg1: i32) -> (i32, i32, i32) {
    %c0_i32 = arith.constant 0 : i32
    %c0_i32_0 = arith.constant 0 : i32
    %c0_i32_1 = arith.constant 0 : i32
    return %arg0, %c0_i32, %c0_i32_0 : i32, i32, i32
  }
}

</mosaic_0001>

<bundles_post_ra>
// kernel: tpu_custom_call.1
= control target key start
LH: loop header
LB: loop body
LE: loop exit
PB: predicated region body
PF: predicated region fallthrough
CT: control target
= control target key end

     0   :  { %6 = vsyncpa [#allocation3], 0  ;;  %s606_s0 = inlined_call_operand.hbm [shape: f32[20,40], index: 0, kind: input, shape index: {}]   ;;  %s607_s1 = inlined_call_operand.vmem [shape: f32[2,8,1], index: 1, kind: output, shape index: {}]  }
   0x1   :  { %8 = vsyncpa [#allocation3 + $0x1], 0  ;;  %s477_s6 = smov 0   ;;  %s479_s7 = smov 0  }
   0x2   :  { %s481_s8 = smov 0   ;;  %s483_s9 = smov 0  }
   0x3   :  { %s485_s10 = smov 0   ;;  %s487_s11 = smov 0  }
   0x4   :  { %s489_s12 = smov 0   ;;  %s491_s13 = smov 0  }
   0x5 LB: > { %s276_s14 = sadd.s32 4294967295, %s463_s13   ;;  %s23_s15 = sadd.s32 1, %s455_s11  ;;  %s463_s13 = sphi %s491_s13, %s14_s13   ;;  %s459_s12 = sphi %s489_s12, %s617_s12   ;;  %s455_s11 = sphi %s487_s11, %s616_s11   ;;  %s451_s10 = sphi %s485_s10, %s615_s10   ;;  %s447_s9 = sphi %s483_s9, %s614_s9   ;;  %s443_s8 = sphi %s481_s8, %s613_s8   ;;  %s439_s7 = sphi %s479_s7, %s612_s7   ;;  %s435_s6 = sphi %s477_s6, %s611_s6  }
   0x6   : > { %p24_p0 = scmp.ge.s32.totalorder %s23_s15, 2  ;;  %s26_s16 = sadd.s32 1, %s459_s12 }
   0x7   : > { %s278_s17 = sshll.u32 %s459_s12, 1  ;;  %s41_s18 = sadd.s32 1, %s443_s8 }
   0x8   : > { %s619_s15 = smov (%p24_p0, %s23_s15), 0  ;;  %s621_s16 = smov (!%p24_p0, %s26_s16), %s459_s12 }
   0x9   : > { %s31_s19 = sadd.s32 %s455_s11, %s278_s17  ;;  %p48_p1 = scmp.ne.s32.totalorder %s443_s8, %s439_s7 }
   0xa   : > { %p28_p2 = scmp.ge.s32.totalorder %s621_s16, 2  ;;  %p32_p3 = scmp.lt.s32.totalorder %s31_s19, 2 }
   0xb   : > { %p49_p4 = scmp.eq.s32.totalorder %s463_s13, 0  ;;  %p54_p5 = scmp.ne.s32.totalorder %s439_s7, %s435_s6 }
   0xc   : > { %s623_s16 = smov (%p28_p2, %s621_s16), 0  ;;  %s625_s19 = smov (!%p32_p3, %s31_s19), 2 }
   0xd   : > { %s279_s20 = sshll.u32 %s623_s16, 1  ;;  %p531_p6 = por %p49_p4, %p48_p1 }
   0xe   : > { %s35_s22 = sadd.s32 %s279_s20, %s619_s15  ;;  %p55_p7 = scmp.eq.s32.totalorder %s276_s14, 0 }
   0xf   : > { %p36_p8 = scmp.lt.s32.totalorder %s35_s22, 2  ;;  %p299_p10 = scmp.lt.s32.totalorder %s463_s13, 4 }
  0x10   : > { %p536_p9 = por %p55_p7, %p54_p5  ;;  %s104_s24 = sand.u32 1, %s443_s8  }
  0x11   : > { %s627_s22 = smov (!%p36_p8, %s35_s22), 2  ;;  %s284_s25 = sshll.u32 %s625_s19, 7 }
  0x12   : > { %s38_s26 = ssub.s32 %s625_s19, %s627_s22  ;;  %s282_s27 = sshll.u32 %s104_s24, 3 }
  0x13   : > { %p39_p11 = scmp.eq.s32.totalorder %s38_s26, 0  ;;  %s117_s30 = scalar_lea.hbm %s606_s0, %s284_s25 }
  0x14   : > { %s108_s3 = scalar_lea.vmem [#allocation2], %s282_s27  ;;  %p550_p12 = pnand %p299_p10, %p531_p6 }
  0x15   : > { %s546_s2 = scalar_select %p39_p11, %s443_s8, %s41_s18  }
  0x16   : > { %s119_s4 = sshll.u32 %s108_s3, 4  ;;  %p285_p13 = scmp.ge.s32.totalorder %s463_s13, 1  ;;  %s120_s4 = int_to_ptr.vmem [resolvable:$true] %s119_s4 }
  0x17   : > { %p124_p0 = scmp.lt.s32.totalorder %s463_s13, 5  ;;  %s105_s6 = scalar_lea.sflag [#allocation3], %s104_s24 }
  0x18   : > { %p371_p1 = pneg %p550_p12  ;;  %s382_s14 = scalar_lea.vmem %s120_s4, 128 }
  0x19   : > { %p383_p2 = scmp.ne.s32.totalorder %s120_s4, %s382_s14  ;;  %s465_s17 = smov [#allocation2]  }
  0x1a   : > { %s387_s18 = sshll.u32 %s465_s17, 4  ;;  %s388_s18 = int_to_ptr.vmem [resolvable:$false] %s387_s18 }
  0x1b   : > { %p385_p3 = pnand %p383_p2, %p371_p1  ;;  %s389_s19 = scalar_lea.vmem %s388_s18, 256 }
  0x1c   : > { %p390_p5 = scmp.lt.s32.totalorder %s120_s4, %s388_s18  ;;  %p391_p6 = scmp.lt.s32.totalorder %s389_s19, %s382_s14 }
  0x1d   : > { %p386_p4 = pneg %p385_p3 }
  0x1e   : > { %p392_p7 = por %p391_p6, %p390_p5 }
  0x20   : > { %p393_p8 = pnand %p392_p7, %p386_p4 }
  0x22   : > { %396 = shalt.err (!%p393_p8)
}
  0x23   : > { %298 = dma.hbm_to_vmem [thread:$0]  (!%p550_p12), %s117_s30, 128, %s120_s4, %s105_s6  }
  0x24   : > { %p125_p10 = pnand %p285_p13, %p124_p0 }
  0x25   : > { %s130_s20 = sand.u32 (!%p125_p10), 1, %s439_s7  }
  0x26   : > { %128 = sbr.rel (%p125_p10) target bundleno = 375 (0x177), region = 24  ;;  %s286_s21 = sshll.u32 (!%p125_p10), %s130_s20, 3 }
  0x27   : > { %s131_s22 = scalar_lea.sflag (!%p125_p10), [#allocation3], %s130_s20  ;;  %s134_s24 = scalar_lea.vmem (!%p125_p10), [#allocation2], %s286_s21 }
  0x2b   : > { %430 = dma.done.wait (%p536_p9), %s131_s22, 128  }
  0x2c   : > { %432 = vsyncadd (%p536_p9), %s131_s22, 4294967168  ;;  %p156_p11 = scmp.lt.s32.totalorder %s451_s10, 1  ;;  %p288_p12 = scmp.ne.s32.totalorder %s447_s9, 0 }
  0x2e   : > { %s157_s25 = scalar_select %p156_p11, %s451_s10, 1 }
  0x2f   : > { %163 = sbr.rel (%p288_p12) target bundleno = 54 (0x36), region = 32 }
  0x30   : > { %s287_s26 = sshll.u32 %s157_s25, 3 }
  0x31   : > { %s574_s29 = scalar_lea.vmem %s607_s1, %s287_s26 }
  0x34   : > { %vm164_vm0 = vcmask 7168   ;;  %v466_v0 = vmov 0.0  }
  0x35   : > { %165 = vst.msk [vmem:[%s574_s29] sm:$0xff] %vm164_vm0, %v466_v0 }
  0x36 PF: > { %v166_v1 = vld [vmem:[%s134_s24] sm:$0xff]  ;;  %vm167_vm1 = vcmask 326656   ;;  %s289_s23 = sshll.u32 %s451_s10, 1  ;;  %v190_v10 = vlaneseq  ;;  %vm198_vm3 = vcmask 7168  }
  0x37   : > { %v168_v2 = vsel %vm167_vm1, %v166_v1, -inf  ;;  %v179_v3 = vsel %vm167_vm1, %v166_v1, 0.0  ;;  %s188_s30 = sadd.s32 %s447_s9, %s289_s23 }
  0x38   : > { %169 = vmax.xlane.f32.xlu0 %v168_v2  ;;  %180 = vadd.xlane.f32.xlu1 %v179_v3  ;;  %s290_s3 = sshll.u32 %s188_s30, 3  ;;  %v191_v12 = vshrl.u32 %v190_v10, 7 }
  0x39   : > { %v192_v13 = vstv %s290_s3 }
  0x3a   : > { %v193_v16 = vadd.s32 %v192_v13, %v191_v12 }
  0x3c   : > { %vm194_vm2 = vcmp.lt.s32.totalorder %v193_v16, 20  ;;  %v196_v20 = vld [vmem:[%s574_s29] sm:$0xff] }
  0xc1   : > { %v170_v4 = vpop.xlane.xlu0 %169  ;;  %v181_v11 = vpop.xlane.xlu1 %180 }
  0xc2   : > { %v171_v5 = vsub.f32 %v166_v1, %v170_v4  ;;  %v183_v14 = vmul.f32 0.025, %v181_v11 }
  0xc4   : > { %v172_v6 = vmul.f32 1.442695, %v171_v5  ;;  %v185_v18 = vmul.f32 0.1, %v183_v14 }
  0xc6   : > { %365 = vpow2.f32 %v172_v6 }
  0xd3   : > { %v366_v7 = vpop.eup %365 }
  0xd4   : > { %v174_v8 = vsel %vm167_vm1, %v366_v7, 0.0 }
  0xd5   : > { %175 = vadd.xlane.f32.xlu0 %v174_v8 }
 0x15e   : > { %v176_v9 = vpop.xlane.xlu0 %175 }
 0x15f   : > { %367 = vlog2.f32 %v176_v9 }
 0x16c   : > { %v368_v15 = vpop.eup %367 }
 0x16d   : > { %v178_v17 = vmul.f32 0.6931472, %v368_v15 }
 0x16f   : > { %v184_v19 = vadd.f32 %v178_v17, %v170_v4 }
 0x171   : > { %v186_v21 = vsub.f32 %v184_v19, %v185_v18 }
 0x173   : > { %v195_v22 = vsel %vm194_vm2, %v186_v21, 0.0 }
 0x174   : > { %v197_v23 = vadd.f32 %v196_v20, %v195_v22 }
 0x176   : > { %199 = vst.msk [vmem:[%s574_s29] sm:$0xff] %vm198_vm3, %v197_v23 }
 0x177 PF: > { %s14_s13 = sadd.s32 1, %s463_s13   ;;  %s611_s6 = smov %s439_s7 }
 0x178   : > { %p11_p9 = scmp.ge.s32.totalorder %s14_s13, 6   ;;  %s612_s7 = smov %s443_s8 }
 0x179   : > { %s613_s8 = smov %s546_s2  ;;  %s614_s9 = smov %s455_s11 }
 0x17a   : > { %s615_s10 = smov %s459_s12  ;;  %s616_s11 = smov %s619_s15 }
 0x17b   : > { %s617_s12 = smov %s623_s16  ;;  %13 = sbr.rel (!%p11_p9) target bundleno = 5 (0x5), region = 68 }
 0x180   :  { %219 = vsyncpa [#allocation3], 1 }
 0x181   :  { %221 = vsyncpa [#allocation3 + $0x1], 1 }

</bundles_post_ra>
